<compile_context>
chip_gen: v7x
topology: tpu7x:2x2x1
jax: 0.10.0
libtpu: 0.0.40
codegen_flags: <defaults>
</compile_context>

<pallas_src>
import functools

import jax
import jax.numpy as jnp
from jax.experimental import pallas as pl
from jax.experimental.pallas import tpu as pltpu


def _round_up(x, m):
    return ((x + m - 1) // m) * m


def _ffn_ln_kernel(x_ref, w1_ref, w2_ref, gamma_ref, beta_ref, o_ref, acc_ref):
    # x_ref:     (tm, D)  f32   (same block for every hidden step)
    # w1_ref:    (D, th)  bf16
    # w2_ref:    (th, D)  bf16
    # gamma/beta:(1, D)   f32
    # o_ref:     (tm, D)  out dtype
    # acc_ref:   (tm, D)  f32 accumulator (scratch, persists across h steps)
    hstep = pl.program_id(1)

    @pl.when(hstep == 0)
    def _():
        acc_ref[...] = jnp.zeros_like(acc_ref)

    # fc1 + ReLU on this hidden slice (bf16 MXU, f32 accumulate).
    x_bf = x_ref[...].astype(jnp.bfloat16)
    h = jnp.dot(x_bf, w1_ref[...], preferred_element_type=jnp.float32)
    h = jnp.maximum(h, 0.0)

    # Partial fc2 contribution of this hidden slice.
    acc_ref[...] += jnp.dot(
        h.astype(jnp.bfloat16), w2_ref[...], preferred_element_type=jnp.float32
    )

    # Finalize: residual add + LayerNorm (f32) + affine, store once.
    @pl.when(hstep == pl.num_programs(1) - 1)
    def _():
        y = acc_ref[...] + x_ref[...].astype(jnp.float32)
        mean = jnp.mean(y, axis=-1, keepdims=True)
        var = jnp.mean((y - mean) ** 2, axis=-1, keepdims=True)
        y_hat = (y - mean) * jax.lax.rsqrt(var + 1e-5)
        out = y_hat * gamma_ref[...] + beta_ref[...]
        o_ref[...] = out.astype(o_ref.dtype)


@functools.partial(jax.jit, static_argnames=("tm", "th"))
def poswise_ffn(x, w1, w2, gamma, beta, *, tm=256, th=512):
    """x: (B, S, D). w1: (D, H), w2: (H, D), gamma/beta: (D,)."""
    B, S, D = x.shape
    H = w1.shape[1]
    M = B * S

    # --- tile selection ---------------------------------------------------
    # Token tile: large (MXU-friendly) but clamped for tiny inputs; keep a
    # multiple of 8 for sublane alignment.
    tm = min(tm, _round_up(M, 8))
    # Hidden tile: must evenly divide H and keep lane alignment; fall back to
    # full H if the requested tile doesn't divide it.
    if H % th != 0 or th % 128 != 0:
        th = H
    M_pad = _round_up(M, tm)

    # --- operand prep -----------------------------------------------------
    x2d = x.reshape(M, D).astype(jnp.float32)
    if M_pad != M:
        # Zero-padded rows are benign (LN of zeros -> zeros) and sliced off.
        x2d = jnp.pad(x2d, ((0, M_pad - M), (0, 0)))
    w1_bf = w1.astype(jnp.bfloat16)
    w2_bf = w2.astype(jnp.bfloat16)
    gamma2d = gamma.reshape(1, D).astype(jnp.float32)
    beta2d = beta.reshape(1, D).astype(jnp.float32)

    # --- VMEM budget (double-buffered BlockSpecs + f32 accumulator) --------
    itemsize_out = jnp.dtype(x.dtype).itemsize
    vmem_needed = (
        2 * (tm * D * 4)            # x tiles (f32)
        + 2 * (tm * D * itemsize_out)  # out tiles
        + 2 * (D * th * 2)          # W1 tiles (bf16)
        + 2 * (th * D * 2)          # W2 tiles (bf16)
        + 2 * (2 * D * 4)           # gamma/beta
        + tm * D * 4                # accumulator scratch
    )
    vmem_limit = int(min(vmem_needed + (16 << 20), 64 << 20))  # safe on v5e/v6e/v7x

    cost = pl.CostEstimate(
        flops=4 * M * D * H,  # two matmuls (2 flops/MAC each)
        transcendentals=0,
        bytes_accessed=2 * M * D * 4 + D * H * 2 + H * D * 2,
    )

    out2d = pl.pallas_call(
        _ffn_ln_kernel,
        out_shape=jax.ShapeDtypeStruct((M_pad, D), x.dtype),
        grid_spec=pltpu.PrefetchScalarGridSpec(
            num_scalar_prefetch=0,
            grid=(M_pad // tm, H // th),
            in_specs=[
                pl.BlockSpec((tm, D), lambda i, k: (i, 0)),   # x tile (reused over k)
                pl.BlockSpec((D, th), lambda i, k: (0, k)),   # W1 hidden slice
                pl.BlockSpec((th, D), lambda i, k: (k, 0)),   # W2 hidden slice
                pl.BlockSpec((1, D), lambda i, k: (0, 0)),    # gamma
                pl.BlockSpec((1, D), lambda i, k: (0, 0)),    # beta
            ],
            out_specs=pl.BlockSpec((tm, D), lambda i, k: (i, 0)),
            scratch_shapes=[pltpu.VMEM((tm, D), jnp.float32)],
        ),
        compiler_params=pltpu.CompilerParams(
            dimension_semantics=("parallel", "arbitrary"),
            vmem_limit_bytes=vmem_limit,
        ),
        cost_estimate=cost,
    )(x2d, w1_bf, w2_bf, gamma2d, beta2d)

    return out2d[:M].reshape(B, S, D)


if __name__ == "__main__":
    # Small shapes consistent with the module: tokens of width d_model,
    # hidden = d_model * mlp_ratio.
    # TODO(synk): toy d_model=32 under-fills the 128 lanes; real d_model>=512
    # is lane-dense and is what the tiling above is sized for.
    B, S = 2, 8
    d_model, mlp_ratio = 32, 4
    hidden = d_model * mlp_ratio

    key = jax.random.PRNGKey(0)
    kx, k1, k2 = jax.random.split(key, 3)

    x = jax.random.normal(kx, (B, S, d_model), dtype=jnp.float32)
    # Deterministic synthetic parameters (no bias in either Linear).
    w1 = jax.random.normal(k1, (d_model, hidden), dtype=jnp.float32) * 0.02
    w2 = jax.random.normal(k2, (hidden, d_model), dtype=jnp.float32) * 0.02
    # LayerNorm affine params at their nn.LayerNorm init values.
    gamma = jnp.ones((d_model,), dtype=jnp.float32)
    beta = jnp.zeros((d_model,), dtype=jnp.float32)

    out = poswise_ffn(x, w1, w2, gamma, beta)
    jax.block_until_ready(out)

    # Pure-JAX f32 reference (kernel matmuls are bf16 -> loosened tolerance).
    h_ref = jnp.maximum(x @ w1, 0.0)
    y_ref = h_ref @ w2 + x
    mu = jnp.mean(y_ref, axis=-1, keepdims=True)
    vr = jnp.mean((y_ref - mu) ** 2, axis=-1, keepdims=True)
    ref = (y_ref - mu) * jax.lax.rsqrt(vr + 1e-5) * gamma + beta
    assert out.shape == ref.shape
    assert jnp.allclose(out, ref, atol=5e-2, rtol=5e-2), (
        "mismatch vs reference: max abs diff = "
        f"{float(jnp.max(jnp.abs(out - ref)))}"
    )

    print("KERNEL_OK")
</pallas_src>

<mosaic_0001>
module attributes {stable_mosaic.version = 11 : i64} {
  func.func @_ffn_ln_kernel(%arg0: i32, %arg1: i32, %arg2: memref<16x32xf32, #tpu.memory_space<vmem>>, %arg3: memref<32x128xbf16, #tpu.memory_space<vmem>>, %arg4: memref<128x32xbf16, #tpu.memory_space<vmem>>, %arg5: memref<1x32xf32, #tpu.memory_space<vmem>>, %arg6: memref<1x32xf32, #tpu.memory_space<vmem>>, %arg7: memref<16x32xf32, #tpu.memory_space<vmem>>, %arg8: memref<16x32xf32, #tpu.memory_space<vmem>>) attributes {dimension_semantics = [#tpu.dimension_semantics<parallel>, #tpu.dimension_semantics<arbitrary>], iteration_bounds = array<i64: 1, 1>, scalar_prefetch = 0 : i64, scratch_operands = 1 : i64, tpu.core_type = #tpu.core_type<tc>, window_params = [{transform_indices = @transform_0, window_bounds = array<i64: 16, 32>}, {transform_indices = @transform_1, window_bounds = array<i64: 32, 128>}, {transform_indices = @transform_2, window_bounds = array<i64: 128, 32>}, {pipeline_mode = #tpu.pipeline_mode<synchronous>, transform_indices = @transform_3, window_bounds = array<i64: 1, 32>}, {pipeline_mode = #tpu.pipeline_mode<synchronous>, transform_indices = @transform_4, window_bounds = array<i64: 1, 32>}, {transform_indices = @transform_5, window_bounds = array<i64: 16, 32>}]} {
    %c0_i32 = arith.constant 0 : i32
    %0 = arith.cmpi eq, %arg1, %c0_i32 : i32
    %1 = arith.extui %0 : i1 to i32
    %c0_i32_0 = arith.constant 0 : i32
    %2 = arith.cmpi ne, %1, %c0_i32_0 : i32
    scf.if %2 {
      %cst_14 = arith.constant 0.000000e+00 : f32
      %18 = vector.broadcast %cst_14 : f32 to vector<16x32xf32>
      %c0_15 = arith.constant 0 : index
      %c0_16 = arith.constant 0 : index
      %19 = vector.load %arg8[%c0_15, %c0_16] : memref<16x32xf32, #tpu.memory_space<vmem>>, vector<16x32xf32>
      tpu.vector_store %arg8[%c0_15, %c0_16], %18 {strides = array<i32>} : memref<16x32xf32, #tpu.memory_space<vmem>>, vector<16x32xf32>,
    } else {
    }
    %c0 = arith.constant 0 : index
    %c0_1 = arith.constant 0 : index
    %3 = vector.load %arg2[%c0, %c0_1] : memref<16x32xf32, #tpu.memory_space<vmem>>, vector<16x32xf32>
    %4 = arith.truncf %3 : vector<16x32xf32> to vector<16x32xbf16>
    %c0_2 = arith.constant 0 : index
    %c0_3 = arith.constant 0 : index
    %5 = vector.load %arg3[%c0_2, %c0_3] : memref<32x128xbf16, #tpu.memory_space<vmem>>, vector<32x128xbf16>
    %cst = arith.constant dense<0.000000e+00> : vector<16x128xf32>
    %6 = tpu.matmul %4, %5, %cst {dimension_numbers = #tpu.dot_dimension_numbers<[1], [0], [0], [1], [0, 0, 1, 1], [], []>} : vector<16x32xbf16>, vector<32x128xbf16>, vector<16x128xf32> -> vector<16x128xf32>
    %cst_4 = arith.constant 0.000000e+00 : f32
    %7 = vector.broadcast %cst_4 : f32 to vector<16x128xf32>
    %8 = arith.maximumf %6, %7 : vector<16x128xf32>
    %c0_5 = arith.constant 0 : index
    %c0_6 = arith.constant 0 : index
    %9 = vector.load %arg8[%c0_5, %c0_6] : memref<16x32xf32, #tpu.memory_space<vmem>>, vector<16x32xf32>
    %10 = arith.truncf %8 : vector<16x128xf32> to vector<16x128xbf16>
    %c0_7 = arith.constant 0 : index
    %c0_8 = arith.constant 0 : index
    %11 = vector.load %arg4[%c0_7, %c0_8] : memref<128x32xbf16, #tpu.memory_space<vmem>>, vector<128x32xbf16>
    %cst_9 = arith.constant dense<0.000000e+00> : vector<16x32xf32>
    %12 = tpu.matmul %10, %11, %cst_9 {dimension_numbers = #tpu.dot_dimension_numbers<[1], [0], [0], [1], [0, 0, 1, 1], [], []>} : vector<16x128xbf16>, vector<128x32xbf16>, vector<16x32xf32> -> vector<16x32xf32>
    %13 = arith.addf %9, %12 : vector<16x32xf32>
    %c0_10 = arith.constant 0 : index
    %c0_11 = arith.constant 0 : index
    %14 = vector.load %arg8[%c0_10, %c0_11] : memref<16x32xf32, #tpu.memory_space<vmem>>, vector<16x32xf32>
    tpu.vector_store %arg8[%c0_10, %c0_11], %13 {strides = array<i32>} : memref<16x32xf32, #tpu.memory_space<vmem>>, vector<16x32xf32>,
    %c0_i32_12 = arith.constant 0 : i32
    %15 = arith.cmpi eq, %arg1, %c0_i32_12 : i32
    %16 = arith.extui %15 : i1 to i32
    %c0_i32_13 = arith.constant 0 : i32
    %17 = arith.cmpi ne, %16, %c0_i32_13 : i32
    scf.if %17 {
      %c0_14 = arith.constant 0 : index
      %c0_15 = arith.constant 0 : index
      %18 = vector.load %arg8[%c0_14, %c0_15] : memref<16x32xf32, #tpu.memory_space<vmem>>, vector<16x32xf32>
      %c0_16 = arith.constant 0 : index
      %c0_17 = arith.constant 0 : index
      %19 = vector.load %arg2[%c0_16, %c0_17] : memref<16x32xf32, #tpu.memory_space<vmem>>, vector<16x32xf32>
      %20 = arith.addf %18, %19 : vector<16x32xf32>
      %cst_18 = arith.constant dense<0.000000e+00> : vector<16xf32>
      %21 = vector.multi_reduction <add>, %20, %cst_18 [1] : vector<16x32xf32> to vector<16xf32>
      %22 = vector.shape_cast %21 : vector<16xf32> to vector<16x1xf32>
      %cst_19 = arith.constant 3.200000e+01 : f32
      %23 = vector.broadcast %cst_19 : f32 to vector<16x1xf32>
      %24 = arith.divf %22, %23 : vector<16x1xf32>
      %25 = vector.broadcast %24 : vector<16x1xf32> to vector<16x32xf32>
      %26 = arith.subf %20, %25 : vector<16x32xf32>
      %27 = arith.mulf %26, %26 : vector<16x32xf32>
      %cst_20 = arith.constant dense<0.000000e+00> : vector<16xf32>
      %28 = vector.multi_reduction <add>, %27, %cst_20 [1] : vector<16x32xf32> to vector<16xf32>
      %29 = vector.shape_cast %28 : vector<16xf32> to vector<16x1xf32>
      %cst_21 = arith.constant 3.200000e+01 : f32
      %30 = vector.broadcast %cst_21 : f32 to vector<16x1xf32>
      %31 = arith.divf %29, %30 : vector<16x1xf32>
      %32 = vector.broadcast %24 : vector<16x1xf32> to vector<16x32xf32>
      %33 = arith.subf %20, %32 : vector<16x32xf32>
      %cst_22 = arith.constant 9.99999974E-6 : f32
      %34 = vector.broadcast %cst_22 : f32 to vector<16x1xf32>
      %35 = arith.addf %31, %34 : vector<16x1xf32>
      %36 = math.rsqrt %35 : vector<16x1xf32>
      %37 = vector.broadcast %36 : vector<16x1xf32> to vector<16x32xf32>
      %38 = arith.mulf %33, %37 : vector<16x32xf32>
      %c0_23 = arith.constant 0 : index
      %c0_24 = arith.constant 0 : index
      %39 = vector.load %arg5[%c0_23, %c0_24] : memref<1x32xf32, #tpu.memory_space<vmem>>, vector<1x32xf32>
      %40 = vector.broadcast %39 : vector<1x32xf32> to vector<16x32xf32>
      %41 = arith.mulf %38, %40 : vector<16x32xf32>
      %c0_25 = arith.constant 0 : index
      %c0_26 = arith.constant 0 : index
      %42 = vector.load %arg6[%c0_25, %c0_26] : memref<1x32xf32, #tpu.memory_space<vmem>>, vector<1x32xf32>
      %43 = vector.broadcast %42 : vector<1x32xf32> to vector<16x32xf32>
      %44 = arith.addf %41, %43 : vector<16x32xf32>
      %c0_27 = arith.constant 0 : index
      %c0_28 = arith.constant 0 : index
      %45 = vector.load %arg7[%c0_27, %c0_28] : memref<16x32xf32, #tpu.memory_space<vmem>>, vector<16x32xf32>
      tpu.vector_store %arg7[%c0_27, %c0_28], %44 {strides = array<i32>} : memref<16x32xf32, #tpu.memory_space<vmem>>, vector<16x32xf32>,
    } else {
    }
    return
  }
  func.func @transform_0(%arg0: i32, %arg1: i32) -> (i32, i32) {
    %c0_i32 = arith.constant 0 : i32
    %c0_i32_0 = arith.constant 0 : i32
    return %arg0, %c0_i32 : i32, i32
  }
  func.func @transform_1(%arg0: i32, %arg1: i32) -> (i32, i32) {
    %c0_i32 = arith.constant 0 : i32
    %c0_i32_0 = arith.constant 0 : i32
    return %c0_i32, %arg1 : i32, i32
  }
  func.func @transform_2(%arg0: i32, %arg1: i32) -> (i32, i32) {
    %c0_i32 = arith.constant 0 : i32
    %c0_i32_0 = arith.constant 0 : i32
    return %arg1, %c0_i32 : i32, i32
  }
  func.func @transform_3(%arg0: i32, %arg1: i32) -> (i32, i32) {
    %c0_i32 = arith.constant 0 : i32
    %c0_i32_0 = arith.constant 0 : i32
    %c0_i32_1 = arith.constant 0 : i32
    return %c0_i32, %c0_i32_0 : i32, i32
  }
  func.func @transform_4(%arg0: i32, %arg1: i32) -> (i32, i32) {
    %c0_i32 = arith.constant 0 : i32
    %c0_i32_0 = arith.constant 0 : i32
    %c0_i32_1 = arith.constant 0 : i32
    return %c0_i32, %c0_i32_0 : i32, i32
  }
  func.func @transform_5(%arg0: i32, %arg1: i32) -> (i32, i32) {
    %c0_i32 = arith.constant 0 : i32
    %c0_i32_0 = arith.constant 0 : i32
    return %arg0, %c0_i32 : i32, i32
  }
}

</mosaic_0001>

<bundles_post_ra>
// kernel: poswise_ffn.1
= control target key start
LH: loop header
LB: loop body
LE: loop exit
PB: predicated region body
PF: predicated region fallthrough
CT: control target
= control target key end

     0   :  { %v375_v1 = vmov 0.0   ;;  %vm376_vm0 = vmmov 0   ;;  %vm26_vm1 = vcmask 261120   ;;  %s475_s0 = inlined_call_operand.vmem [shape: f32[16,32], index: 0, kind: input, shape index: {}]   ;;  %s476_s1 = inlined_call_operand.vmem [shape: bf16[32,128], index: 1, kind: input, shape index: {}]   ;;  %s477_s2 = inlined_call_operand.vmem [shape: bf16[128,32], index: 2, kind: input, shape index: {}]   ;;  %s478_s3 = inlined_call_operand.vmem [shape: f32[1,32], index: 3, kind: input, shape index: {}]   ;;  %s479_s4 = inlined_call_operand.vmem [shape: f32[1,32], index: 4, kind: input, shape index: {}]   ;;  %s480_s5 = inlined_call_operand.hbm [shape: f32[16,32], index: 5, kind: output, shape index: {}]  }
   0x1   :  { %v337_v0 = vld [vmem:[%s476_s1] sm:$0xff]   ;;  %304 = vmatprep.subr.bf16.mxu0 %v375_v1  ;;  %v338_v2 = vld [vmem:[%s476_s1 + $0x8] sm:$0xff]   ;;  %312 = vmatprep.subr.bf16.mxu1 %v375_v1  ;;  %27 = vst.msk [vmem:[#allocation2] sm:$0xff] %vm26_vm1, %v375_v1  ;;  %28 = vst.msk [vmem:[#allocation2 + $0x8] sm:$0xff] %vm26_vm1, %v375_v1 }
   0x2   :  { %305 = vmatpush3.bf16.msra.mxu0 %v337_v0  ;;  %308 = vmatprep.mubr.msk.bf16.mxu0 %vm376_vm0, %v375_v1  ;;  %v29_v3 = vld [vmem:[%s475_s0] sm:$0xff]  ;;  %v30_v4 = vld [vmem:[%s475_s0 + $0x8] sm:$0xff]  ;;  %v341_v8 = vld [vmem:[%s477_s2 + $0x10] sm:$0xff]  }
   0x3   :  { %306 = vmatprep.subr.bf16.mxu0 %v375_v1  ;;  %v339_v5 = vld [vmem:[%s477_s2] sm:$0xff]   ;;  %328 = vmatprep.mubr.msk.bf16.mxu1 %vm376_vm0, %v375_v1  ;;  %v31_v6 = vpack.c.bf16 %v30_v4, %v29_v3  ;;  %v340_v7 = vld [vmem:[%s477_s2 + $0x8] sm:$0xff]  }
   0x4   :  { %313 = vmatpush3.bf16.msra.mxu1 %v339_v5 }
   0x5   :  { %314 = vmatprep.subr.bf16.mxu1 %v375_v1 }
   0x6   :  { %307 = vmatpush3.bf16.msra.mxu0 %v338_v2 }
   0x8   :  { %315 = vmatpush3.bf16.msra.mxu1 %v340_v7 }
   0x9   :  { %309 = vmatmul.mubr.msk.bf16.vlgmr.msra.gmra.mrb[0].mxu0 %vm26_vm1, %v31_v6  ;;  %316 = vmatprep.subr.bf16.mxu1 %v375_v1 }
   0xa   :  { %10 = vsyncpa [#allocation4], 0  ;;  %v342_v9 = vld [vmem:[%s477_s2 + $0x18] sm:$0xff]   ;;  %v343_v10 = vld [vmem:[%s477_s2 + $0x20] sm:$0xff]   ;;  %s377_s18 = smov [#allocation3]  }
   0xb   :  { %v344_v11 = vld [vmem:[%s477_s2 + $0x28] sm:$0xff]   ;;  %v345_v12 = vld [vmem:[%s477_s2 + $0x30] sm:$0xff]   ;;  %v346_v13 = vld [vmem:[%s477_s2 + $0x38] sm:$0xff]   ;;  %s268_s19 = sshll.u32 %s377_s18, 4  ;;  %s269_s19 = int_to_ptr.vmem [resolvable:$true] %s268_s19 }
   0xc   :  { %317 = vmatpush3.bf16.msra.mxu1 %v341_v8  ;;  %v95_v21 = vld [vmem:[#allocation2] sm:$0xff]  ;;  %v96_v23 = vld [vmem:[#allocation2 + $0x8] sm:$0xff]  ;;  %s351_s20 = scalar_lea.vmem %s269_s19, 256  ;;  %p356_p1 = scmp.lt.s32.totalorder %s269_s19, %s269_s19 }
   0xd   :  { %318 = vmatprep.subr.bf16.mxu1 %v375_v1  ;;  %v290_v52 = vld [vmem:[%s478_s3] ss:$0 sm:$0xff]  ;;  %p352_p0 = scmp.ne.s32.totalorder %s269_s19, %s351_s20  ;;  %p357_p2 = scmp.lt.s32.totalorder %s351_s20, %s351_s20 }
   0xe   :  { %v291_v54 = vld [vmem:[%s479_s4] ss:$0 sm:$0xff] }
   0xf   :  { %p358_p3 = por %p357_p2, %p356_p1 }
  0x10   :  { %319 = vmatpush3.bf16.msra.mxu1 %v342_v9 }
  0x11   :  { %320 = vmatprep.subr.bf16.mxu1 %v375_v1  ;;  %p359_p4 = pnand %p358_p3, %p352_p0 }
  0x14   :  { %321 = vmatpush3.bf16.msra.mxu1 %v343_v10 }
  0x15   :  { %322 = vmatprep.subr.bf16.mxu1 %v375_v1 }
  0x18   :  { %323 = vmatpush3.bf16.msra.mxu1 %v344_v11 }
  0x19   :  { %324 = vmatprep.subr.bf16.mxu1 %v375_v1 }
  0x1c   :  { %325 = vmatpush3.bf16.msra.mxu1 %v345_v12 }
  0x1d   :  { %326 = vmatprep.subr.bf16.mxu1 %v375_v1 }
  0x20   :  { %327 = vmatpush3.bf16.msra.mxu1 %v346_v13 }
  0xdc   :  { %v86_v14 = vpop.f32.mrb[0].mxu0 }
  0xdd   :  { %v310_v15 = vpop.f32.mrb[1].mxu0  ;;  %v93_v17 = vmax.f32 %v86_v14, 0.0 }
  0xde   :  { %v89_v16 = vpop.f32.mrb[2].mxu0 }
  0xdf   :  { %v94_v18 = vmax.f32 %v89_v16, 0.0  ;;  %v311_v19 = vpop.f32.mrb[3].mxu0 }
  0xe1   :  { %v97_v20 = vpack.c.bf16 %v94_v18, %v93_v17 }
  0xe3   :  { %329 = vmatmul.mubr.bf16.vlgmr.msra.gmra.mrb[0].mxu1 %v97_v20 }
 0x1b6   :  { %v196_v22 = vpop.f32.mrb[0].mxu1 }
 0x1b7   :  { %v203_v24 = vadd.f32 %v196_v22, %v95_v21  ;;  %v330_v25 = vpop.f32.mrb[1].mxu1 }
 0x1b8   :  { %v199_v26 = vpop.f32.mrb[2].mxu1 }
 0x1b9   :  { %205 = vst.msk [vmem:[#allocation2] sm:$0xff] %vm26_vm1, %v203_v24  ;;  %v204_v27 = vadd.f32 %v199_v26, %v96_v23  ;;  %v331_v28 = vpop.f32.mrb[3].mxu1 }
 0x1bb   :  { %206 = vst.msk [vmem:[#allocation2 + $0x8] sm:$0xff] %vm26_vm1, %v204_v27 }
 0x1c0   :  { %v210_v29 = vld [vmem:[#allocation2] sm:$0xff] }
 0x1c1   :  { %v214_v30 = vadd.f32 %v210_v29, %v29_v3 }
 0x1c2   :  { %v211_v31 = vld [vmem:[#allocation2 + $0x8] sm:$0xff] }
 0x1c3   :  { %v216_v32 = vsel %vm26_vm1, %v214_v30, 0.0  ;;  %v215_v33 = vadd.f32 %v211_v31, %v30_v4 }
 0x1c4   :  { %217 = vadd.xlane.f32.xlu0 %v216_v32 }
 0x1c5   :  { %v219_v34 = vsel %vm26_vm1, %v215_v33, 0.0 }
 0x1c8   :  { %220 = vadd.xlane.f32.xlu0 %v219_v34 }
 0x251   :  { %v218_v35 = vpop.xlane.xlu0 %217 }
 0x252   :  { %v223_v36 = vmul.f32 0.03125, %v218_v35 }
 0x254   :  { %v225_v37 = vsub.f32 %v214_v30, %v223_v36 }
 0x255   :  { %v221_v38 = vpop.xlane.xlu0 %220 }
 0x256   :  { %v224_v39 = vmul.f32 0.03125, %v221_v38  ;;  %v227_v40 = vmul.f32 %v225_v37, %v225_v37 }
 0x258   :  { %v226_v41 = vsub.f32 %v215_v33, %v224_v39  ;;  %v229_v42 = vsel %vm26_vm1, %v227_v40, 0.0 }
 0x259   :  { %230 = vadd.xlane.f32.xlu1 %v229_v42 }
 0x25a   :  { %v228_v43 = vmul.f32 %v226_v41, %v226_v41 }
 0x25c   :  { %v232_v44 = vsel %vm26_vm1, %v228_v43, 0.0 }
 0x25d   :  { %233 = vadd.xlane.f32.xlu1 %v232_v44 }
 0x2e6   :  { %v231_v45 = vpop.xlane.xlu1 %230 }
 0x2e7   :  { %v235_v46 = vmul.f32 0.03125, %v231_v45 }
 0x2e9   :  { %v237_v47 = vadd.f32 1e-05, %v235_v46 }
 0x2ea   :  { %v234_v48 = vpop.xlane.xlu1 %233 }
 0x2eb   :  { %347 = vrsqrt.f32 %v237_v47  ;;  %v236_v49 = vmul.f32 0.03125, %v234_v48 }
 0x2ed   :  { %v238_v50 = vadd.f32 1e-05, %v236_v49 }
 0x2ef   :  { %349 = vrsqrt.f32 %v238_v50 }
 0x2f5   :  { %v348_v51 = vpop.eup %347 }
 0x2f6   :  { %v241_v53 = vmul.f32 %v348_v51, %v225_v37 }
 0x2f8   :  { %v250_v55 = vmul.f32 %v290_v52, %v241_v53 }
 0x2f9   :  { %v350_v56 = vpop.eup %349 }
 0x2fa   :  { %v242_v57 = vmul.f32 %v350_v56, %v226_v41  ;;  %v259_v58 = vadd.f32 %v291_v54, %v250_v55 }
 0x2fc   :  { %v251_v59 = vmul.f32 %v290_v52, %v242_v57  ;;  %261 = vst.msk [vmem:[#allocation3] sm:$0xff] %vm26_vm1, %v259_v58 }
 0x2fe   :  { %v260_v60 = vadd.f32 %v291_v54, %v251_v59 }
 0x300   :  { %262 = vst.msk [vmem:[#allocation3 + $0x8] sm:$0xff] %vm26_vm1, %v260_v60 }
 0x301   :  { %362 = shalt.err (!%p359_p4)
}
 0x302   :  { %s363_s21 = scalar_lea.hbm %s480_s5, 256 }
 0x303   :  { %p364_p5 = scmp.ne.s32.totalorder %s480_s5, %s363_s21  ;;  %p367_p6 = scmp.lt.u32.totalorder %s363_s21, %s480_s5 }
 0x305   :  { %p369_p7 = pnand %p367_p6, %p364_p5 }
 0x307   :  { %372 = shalt.err (!%p369_p7)
}
 0x308   :  { %s378_s26 = smov 128   ;;  %s379_s1 = smov 8  }
 0x309   :  { %274 = dma.vmem_to_hbm [thread:$0]  %s269_s19, 256, %s480_s5, [#allocation4], %s378_s26, %s378_s26, %s379_s1  }
 0x30a   :  { %373 = dma.done.wait [#allocation4], 256  }
 0x30b   :  { %374 = vsyncadd [#allocation4], 4294967040 }
 0x30c   :  { %278 = vsyncpa [#allocation4], 1 }

</bundles_post_ra>
